<compile_context>
chip_gen: v7x
topology: tpu7x:2x2x1
jax: 0.10.0
libtpu: 0.0.40
codegen_flags: <defaults>
</compile_context>

<pallas_src>
import jax
import jax.numpy as jnp
from jax.experimental import pallas as pl
from jax.experimental.pallas import tpu as pltpu


def _f32_block_budget_bytes():
    """Per-input-block f32 working-set budget, generation aware."""
    try:
        vmem_cap = int(getattr(pltpu.get_tpu_info(), "vmem_capacity_bytes", 0))
    except Exception:
        vmem_cap = 0
    if vmem_cap and vmem_cap < (96 << 20):
        # v7x-class: only 64 MiB VMEM but 3.2 TB/s HBM -> larger tiles to
        # amortize the ~0.35 us fixed per-grid-step overhead.
        return 12 << 20
    # 128 MiB-class (v5e / v6e) or unknown backend: 8 MiB tiles keep per-step
    # overhead at a few percent with lots of VMEM headroom.
    return 8 << 20


def _choose_tiles(b, s, d, budget_f32_bytes):
    """Pick (TB, TS) so the f32 working set of a (TB, TS, D) block fits budget.

    TS only needs to be a multiple of 8 (or the full S): the input block's
    trailing dims are (TS, D) with D full, and the (S, 1) stats outputs use
    (TS, 1) blocks whose trailing dim equals the full extent.  TB (the
    reduction axis) is maximized first — fewer B grid steps means fewer Chan
    combines and fewer fixed per-step overheads.  TS growth is capped so at
    least two S tiles remain (when possible) to feed both v7x TensorCores.
    """
    ts_cands = [k for k in range(8, s + 1, 8) if s % k == 0] or [s]
    ts = ts_cands[0]
    tb = 1
    for cand in sorted((k for k in range(1, b + 1) if b % k == 0), reverse=True):
        if cand * ts * d * 4 <= budget_f32_bytes:
            tb = cand
            break
    for cand in reversed(ts_cands):
        if (cand * tb * d * 4 <= budget_f32_bytes
                and (s // cand >= 2 or cand == ts_cands[0])):
            ts = cand
            break
    return tb, ts


def prenorm_stats(x, block_budget_bytes=None):
    """Per-sequence-position mean / unbiased var over dims (0, 2) of (B,S,D) x."""
    b, s, d = x.shape
    itemsize = jnp.dtype(x.dtype).itemsize
    budget = (block_budget_bytes if block_budget_bytes is not None
              else _f32_block_budget_bytes())

    # Awkward S (not a multiple of 8) whose full-S block would bust the
    # budget: pad S so it can be tiled.  Per-position stats are independent,
    # so padded positions are simply dropped afterwards.
    s_pad = s
    if s % 8 != 0 and s * d * 4 > 2 * budget:
        s_pad = ((s + 7) // 8) * 8
        x = jnp.pad(x, ((0, 0), (0, s_pad - s), (0, 0)))

    tb, ts = _choose_tiles(b, s_pad, d, budget)

    n_tile = tb * d                       # elements reduced per B-tile per position
    n_total = b * d                       # total elements reduced per position
    # torch.var(ddof=1) would be NaN for a single reduced element; we guard the
    # denominator and return 0 instead (documented semantic divergence).
    inv_nm1 = 1.0 / float(max(n_total - 1, 1))
    inv_n_tile = 1.0 / float(n_tile)
    n_tile_f = float(n_tile)

    def kernel(x_ref, mean_ref, var_ref, mean_acc, m2_acc):
        bi = pl.program_id(1)

        xt = x_ref[...].astype(jnp.float32)          # (TB, TS, D)

        # Single fused pass: raw sum + sum-of-squares.  The TB axis is reduced
        # first (pure element-wise VALU adds) so only one cross-lane (XLU)
        # reduction over D is issued per quantity.
        xs = jnp.sum(xt, axis=0)                     # (TS, D)
        xq = jnp.sum(xt * xt, axis=0)                # (TS, D)
        s1 = jnp.sum(xs, axis=-1, keepdims=True)     # (TS, 1)
        s2 = jnp.sum(xq, axis=-1, keepdims=True)     # (TS, 1)

        mean_t = s1 * inv_n_tile
        # Per-tile centered second moment (s2 - s1^2/n).  Cancellation only
        # bites when |mean| >> std; the cross-tile combine stays in the
        # numerically stable Chan form below.
        m2_t = s2 - s1 * mean_t

        @pl.when(bi == 0)
        def _():
            mean_acc[...] = jnp.zeros_like(mean_acc)
            m2_acc[...] = jnp.zeros_like(m2_acc)

        # Chan parallel combination of (count, mean, M2) across B tiles in f32.
        # Counts are exact by construction: n_a = bi*n_tile, n_new = (bi+1)*n_tile,
        # hence n_tile/n_new = 1/(bi+1) and n_a*n_tile/n_new = n_tile*bi/(bi+1);
        # only the small loop index `bi` is ever cast to float.
        bi_f = bi.astype(jnp.float32)
        w = 1.0 / (bi_f + 1.0)
        delta = mean_t - mean_acc[...]
        mean_acc[...] = mean_acc[...] + delta * w
        m2_acc[...] = m2_acc[...] + m2_t + (delta * delta) * (n_tile_f * bi_f * w)

        @pl.when(bi == pl.num_programs(1) - 1)
        def _():
            mean_ref[...] = mean_acc[...]
            var_ref[...] = m2_acc[...] * inv_nm1

    in_block_bytes = tb * ts * d * itemsize
    f32_block_bytes = tb * ts * d * 4
    # Double-buffered input + f32 cast/square temporaries + margin; clamp to a
    # range that is safe on every generation (v7x physical VMEM is 64 MiB).
    vmem_limit = int(min(max(2 * in_block_bytes + 3 * f32_block_bytes + (4 << 20),
                             16 << 20),
                         60 << 20))

    cost = pl.CostEstimate(
        flops=3 * b * s_pad * d,
        transcendentals=0,
        bytes_accessed=b * s_pad * d * itemsize + 2 * s_pad * 4,
    )

    mean, var = pl.pallas_call(
        kernel,
        grid=(s_pad // ts, b // tb),
        in_specs=[pl.BlockSpec((tb, ts, d), lambda si, bi: (bi, si, 0))],
        out_specs=(
            pl.BlockSpec((ts, 1), lambda si, bi: (si, 0)),
            pl.BlockSpec((ts, 1), lambda si, bi: (si, 0)),
        ),
        out_shape=(
            jax.ShapeDtypeStruct((s_pad, 1), jnp.float32),
            jax.ShapeDtypeStruct((s_pad, 1), jnp.float32),
        ),
        scratch_shapes=[
            pltpu.VMEM((ts, 1), jnp.float32),   # running mean
            pltpu.VMEM((ts, 1), jnp.float32),   # running M2
        ],
        compiler_params=pltpu.CompilerParams(
            dimension_semantics=("parallel", "arbitrary"),
            vmem_limit_bytes=vmem_limit,
        ),
        cost_estimate=cost,
    )(x)
    return mean[:s, 0], var[:s, 0]


def prenorm_forward(x, is_pre=False):
    """Pallas implementation of PreNorm.forward.

    Returns:
      is_pre=False: x
      is_pre=True : (x, mean, var) with mean/var of shape (S,), float32.
    """
    if not is_pre:
        return x
    mean, var = prenorm_stats(x)
    # Pass-through output is simply x (JAX arrays are immutable) — no extra
    # HBM copy is performed.
    return x, mean, var


if __name__ == "__main__":
    key = jax.random.PRNGKey(0)

    # Small shape implied by the forward: (batch=2, seq=8, hidden=32).
    x = jax.random.normal(key, (2, 8, 32), dtype=jnp.float32)
    y, mean, var = prenorm_forward(x, is_pre=True)
    jax.block_until_ready((y, mean, var))

    assert jnp.allclose(y, x), "pass-through mismatch"
    assert jnp.allclose(mean, jnp.mean(x, axis=(0, 2)), atol=1e-5), "mean mismatch"
    assert jnp.allclose(var, jnp.var(x, axis=(0, 2), ddof=1), atol=1e-5), "var mismatch"

    # Lane/tile-exercising shape: two S tiles (parallel axis), TB maximized.
    x2 = jax.random.normal(jax.random.PRNGKey(1), (4, 256, 128),
                           dtype=jnp.float32) * 3.0 + 5.0
    _, mean2, var2 = prenorm_forward(x2, is_pre=True)
    jax.block_until_ready((mean2, var2))
    assert jnp.allclose(mean2, jnp.mean(x2, axis=(0, 2)), atol=1e-4, rtol=1e-5)
    assert jnp.allclose(var2, jnp.var(x2, axis=(0, 2), ddof=1), atol=1e-3, rtol=1e-4)

    # Force multiple reduction (B) grid steps with a tiny block budget so the
    # cross-tile Chan combine path is exercised.
    x3 = jax.random.normal(jax.random.PRNGKey(2), (8, 128, 128),
                           dtype=jnp.float32) * 2.0 + 3.0
    mean3, var3 = prenorm_stats(x3, block_budget_bytes=16 << 10)
    jax.block_until_ready((mean3, var3))
    assert jnp.allclose(mean3, jnp.mean(x3, axis=(0, 2)), atol=1e-4, rtol=1e-5)
    assert jnp.allclose(var3, jnp.var(x3, axis=(0, 2), ddof=1), atol=1e-3, rtol=1e-4)

    # is_pre=False path: identity only (no kernel launched).
    y2 = prenorm_forward(x, is_pre=False)
    jax.block_until_ready(y2)
    assert jnp.allclose(y2, x)

    print("KERNEL_OK")
</pallas_src>

<mosaic_0001>
module attributes {stable_mosaic.version = 11 : i64} {
  func.func @kernel(%arg0: i32, %arg1: i32, %arg2: memref<2x8x32xf32, #tpu.memory_space<vmem>>, %arg3: memref<8x1xf32, #tpu.memory_space<vmem>>, %arg4: memref<8x1xf32, #tpu.memory_space<vmem>>, %arg5: memref<8x1xf32, #tpu.memory_space<vmem>>, %arg6: memref<8x1xf32, #tpu.memory_space<vmem>>) attributes {dimension_semantics = [#tpu.dimension_semantics<parallel>, #tpu.dimension_semantics<arbitrary>], iteration_bounds = array<i64: 1, 1>, scalar_prefetch = 0 : i64, scratch_operands = 2 : i64, tpu.core_type = #tpu.core_type<tc>, window_params = [{transform_indices = @transform_0, window_bounds = array<i64: 2, 8, 32>}, {transform_indices = @transform_1, window_bounds = array<i64: 8, 1>}, {transform_indices = @transform_2, window_bounds = array<i64: 8, 1>}]} {
    %c0 = arith.constant 0 : index
    %c0_0 = arith.constant 0 : index
    %c0_1 = arith.constant 0 : index
    %0 = vector.load %arg2[%c0, %c0_0, %c0_1] : memref<2x8x32xf32, #tpu.memory_space<vmem>>, vector<2x8x32xf32>
    %cst = arith.constant dense<0.000000e+00> : vector<8x32xf32>
    %1 = vector.multi_reduction <add>, %0, %cst [0] : vector<2x8x32xf32> to vector<8x32xf32>
    %2 = arith.mulf %0, %0 : vector<2x8x32xf32>
    %cst_2 = arith.constant dense<0.000000e+00> : vector<8x32xf32>
    %3 = vector.multi_reduction <add>, %2, %cst_2 [0] : vector<2x8x32xf32> to vector<8x32xf32>
    %cst_3 = arith.constant dense<0.000000e+00> : vector<8xf32>
    %4 = vector.multi_reduction <add>, %1, %cst_3 [1] : vector<8x32xf32> to vector<8xf32>
    %5 = vector.shape_cast %4 : vector<8xf32> to vector<8x1xf32>
    %cst_4 = arith.constant dense<0.000000e+00> : vector<8xf32>
    %6 = vector.multi_reduction <add>, %3, %cst_4 [1] : vector<8x32xf32> to vector<8xf32>
    %7 = vector.shape_cast %6 : vector<8xf32> to vector<8x1xf32>
    %cst_5 = arith.constant 1.562500e-02 : f32
    %8 = vector.broadcast %cst_5 : f32 to vector<8x1xf32>
    %9 = arith.mulf %5, %8 : vector<8x1xf32>
    %10 = arith.mulf %5, %9 : vector<8x1xf32>
    %11 = arith.subf %7, %10 : vector<8x1xf32>
    %c0_i32 = arith.constant 0 : i32
    %12 = arith.cmpi eq, %arg1, %c0_i32 : i32
    %13 = arith.extui %12 : i1 to i32
    %c0_i32_6 = arith.constant 0 : i32
    %14 = arith.cmpi ne, %13, %c0_i32_6 : i32
    scf.if %14 {
      %cst_22 = arith.constant 0.000000e+00 : f32
      %37 = vector.broadcast %cst_22 : f32 to vector<8x1xf32>
      %c0_23 = arith.constant 0 : index
      %c0_24 = arith.constant 0 : index
      %38 = vector.load %arg5[%c0_23, %c0_24] : memref<8x1xf32, #tpu.memory_space<vmem>>, vector<8x1xf32>
      tpu.vector_store %arg5[%c0_23, %c0_24], %37 {strides = array<i32>} : memref<8x1xf32, #tpu.memory_space<vmem>>, vector<8x1xf32>,
      %cst_25 = arith.constant 0.000000e+00 : f32
      %39 = vector.broadcast %cst_25 : f32 to vector<8x1xf32>
      %c0_26 = arith.constant 0 : index
      %c0_27 = arith.constant 0 : index
      %40 = vector.load %arg6[%c0_26, %c0_27] : memref<8x1xf32, #tpu.memory_space<vmem>>, vector<8x1xf32>
      tpu.vector_store %arg6[%c0_26, %c0_27], %39 {strides = array<i32>} : memref<8x1xf32, #tpu.memory_space<vmem>>, vector<8x1xf32>,
    } else {
    }
    %15 = arith.sitofp %arg1 : i32 to f32
    %cst_7 = arith.constant 1.000000e+00 : f32
    %16 = arith.addf %15, %cst_7 : f32
    %cst_8 = arith.constant 1.000000e+00 : f32
    %17 = arith.divf %cst_8, %16 : f32
    %c0_9 = arith.constant 0 : index
    %c0_10 = arith.constant 0 : index
    %18 = vector.load %arg5[%c0_9, %c0_10] : memref<8x1xf32, #tpu.memory_space<vmem>>, vector<8x1xf32>
    %19 = arith.subf %9, %18 : vector<8x1xf32>
    %c0_11 = arith.constant 0 : index
    %c0_12 = arith.constant 0 : index
    %20 = vector.load %arg5[%c0_11, %c0_12] : memref<8x1xf32, #tpu.memory_space<vmem>>, vector<8x1xf32>
    %21 = vector.broadcast %17 : f32 to vector<8x1xf32>
    %22 = arith.mulf %19, %21 : vector<8x1xf32>
    %23 = arith.addf %20, %22 : vector<8x1xf32>
    %c0_13 = arith.constant 0 : index
    %c0_14 = arith.constant 0 : index
    %24 = vector.load %arg5[%c0_13, %c0_14] : memref<8x1xf32, #tpu.memory_space<vmem>>, vector<8x1xf32>
    tpu.vector_store %arg5[%c0_13, %c0_14], %23 {strides = array<i32>} : memref<8x1xf32, #tpu.memory_space<vmem>>, vector<8x1xf32>,
    %c0_15 = arith.constant 0 : index
    %c0_16 = arith.constant 0 : index
    %25 = vector.load %arg6[%c0_15, %c0_16] : memref<8x1xf32, #tpu.memory_space<vmem>>, vector<8x1xf32>
    %26 = arith.addf %25, %11 : vector<8x1xf32>
    %27 = arith.mulf %19, %19 : vector<8x1xf32>
    %cst_17 = arith.constant 6.400000e+01 : f32
    %28 = arith.mulf %cst_17, %15 : f32
    %29 = arith.mulf %28, %17 : f32
    %30 = vector.broadcast %29 : f32 to vector<8x1xf32>
    %31 = arith.mulf %27, %30 : vector<8x1xf32>
    %32 = arith.addf %26, %31 : vector<8x1xf32>
    %c0_18 = arith.constant 0 : index
    %c0_19 = arith.constant 0 : index
    %33 = vector.load %arg6[%c0_18, %c0_19] : memref<8x1xf32, #tpu.memory_space<vmem>>, vector<8x1xf32>
    tpu.vector_store %arg6[%c0_18, %c0_19], %32 {strides = array<i32>} : memref<8x1xf32, #tpu.memory_space<vmem>>, vector<8x1xf32>,
    %c0_i32_20 = arith.constant 0 : i32
    %34 = arith.cmpi eq, %arg1, %c0_i32_20 : i32
    %35 = arith.extui %34 : i1 to i32
    %c0_i32_21 = arith.constant 0 : i32
    %36 = arith.cmpi ne, %35, %c0_i32_21 : i32
    scf.if %36 {
      %c0_22 = arith.constant 0 : index
      %c0_23 = arith.constant 0 : index
      %37 = vector.load %arg5[%c0_22, %c0_23] : memref<8x1xf32, #tpu.memory_space<vmem>>, vector<8x1xf32>
      %c0_24 = arith.constant 0 : index
      %c0_25 = arith.constant 0 : index
      %38 = vector.load %arg3[%c0_24, %c0_25] : memref<8x1xf32, #tpu.memory_space<vmem>>, vector<8x1xf32>
      tpu.vector_store %arg3[%c0_24, %c0_25], %37 {strides = array<i32>} : memref<8x1xf32, #tpu.memory_space<vmem>>, vector<8x1xf32>,
      %c0_26 = arith.constant 0 : index
      %c0_27 = arith.constant 0 : index
      %39 = vector.load %arg6[%c0_26, %c0_27] : memref<8x1xf32, #tpu.memory_space<vmem>>, vector<8x1xf32>
      %cst_28 = arith.constant 0.0158730168 : f32
      %40 = vector.broadcast %cst_28 : f32 to vector<8x1xf32>
      %41 = arith.mulf %39, %40 : vector<8x1xf32>
      %c0_29 = arith.constant 0 : index
      %c0_30 = arith.constant 0 : index
      %42 = vector.load %arg4[%c0_29, %c0_30] : memref<8x1xf32, #tpu.memory_space<vmem>>, vector<8x1xf32>
      tpu.vector_store %arg4[%c0_29, %c0_30], %41 {strides = array<i32>} : memref<8x1xf32, #tpu.memory_space<vmem>>, vector<8x1xf32>,
    } else {
    }
    return
  }
  func.func @transform_0(%arg0: i32, %arg1: i32) -> (i32, i32, i32) {
    %c0_i32 = arith.constant 0 : i32
    %c0_i32_0 = arith.constant 0 : i32
    return %arg1, %arg0, %c0_i32 : i32, i32, i32
  }
  func.func @transform_1(%arg0: i32, %arg1: i32) -> (i32, i32) {
    %c0_i32 = arith.constant 0 : i32
    %c0_i32_0 = arith.constant 0 : i32
    return %arg0, %c0_i32 : i32, i32
  }
  func.func @transform_2(%arg0: i32, %arg1: i32) -> (i32, i32) {
    %c0_i32 = arith.constant 0 : i32
    %c0_i32_0 = arith.constant 0 : i32
    return %arg0, %c0_i32 : i32, i32
  }
}

</mosaic_0001>

<bundles_post_ra>
// kernel: tpu_custom_call.1
= control target key start
LH: loop header
LB: loop body
LE: loop exit
PB: predicated region body
PF: predicated region fallthrough
CT: control target
= control target key end

     0   :  { %8 = vsyncpa [#allocation5], 0  ;;  %s117_s9 = smov [#allocation4]   ;;  %s160_s0 = inlined_call_operand.hbm [shape: f32[2,8,32], index: 0, kind: input, shape index: {}]   ;;  %s161_s1 = inlined_call_operand.vmem [shape: f32[8,1], index: 1, kind: output, shape index: {0}]   ;;  %s162_s2 = inlined_call_operand.vmem [shape: f32[8,1], index: 2, kind: output, shape index: {1}]  }
   0x1   :  { %s14_s10 = sshll.u32 %s117_s9, 4  ;;  %s93_s13 = scalar_lea.hbm %s160_s0, 256  ;;  %s15_s10 = int_to_ptr.vmem [resolvable:$true] %s14_s10 }
   0x2   :  { %p94_p0 = scmp.ne.s32.totalorder %s160_s0, %s93_s13  ;;  %p97_p1 = scmp.lt.u32.totalorder %s93_s13, %s160_s0 }
   0x4   :  { %p99_p2 = pnand %p97_p1, %p94_p0 }
   0x6   :  { %102 = shalt.err (!%p99_p2)
}
   0x7   :  { %s103_s18 = scalar_lea.vmem %s15_s10, 256  ;;  %p108_p4 = scmp.lt.s32.totalorder %s15_s10, %s15_s10 }
   0x8   :  { %p104_p3 = scmp.ne.s32.totalorder %s15_s10, %s103_s18  ;;  %p109_p5 = scmp.lt.s32.totalorder %s103_s18, %s103_s18 }
   0xa   :  { %p110_p6 = por %p109_p5, %p108_p4 }
   0xc   :  { %p111_p7 = pnand %p110_p6, %p104_p3 }
   0xe   :  { %114 = shalt.err (!%p111_p7)
}
   0xf   :  { %s118_s19 = smov 128   ;;  %s119_s20 = smov 8  }
  0x10   :  { %20 = dma.hbm_to_vmem [thread:$0]  %s160_s0, 256, %s15_s10, [#allocation5], %s118_s19, %s118_s19, %s119_s20  }
  0x11   :  { %115 = dma.done.wait [#allocation5], 256  }
  0x12   :  { %116 = vsyncadd [#allocation5], 4294967040  ;;  %vm48_vm0 = vcmask 7168   ;;  %v120_v0 = vmov 0.0   ;;  %vm26_vm1 = vcmask 261120   ;;  %v24_v1 = vld [vmem:[#allocation4] sm:$0xff] }
  0x13   :  { %49 = vst.msk [vmem:[#allocation2] sm:$0xff] %vm48_vm0, %v120_v0  ;;  %50 = vst.msk [vmem:[#allocation3] sm:$0xff] %vm48_vm0, %v120_v0  ;;  %v25_v2 = vld [vmem:[#allocation4 + $0x8] sm:$0xff]  ;;  %v27_v3 = vsel %vm26_vm1, %v24_v1, 0.0  ;;  %v30_v5 = vmul.f32 %v24_v1, %v24_v1 }
  0x14   :  { %v28_v4 = vsel %vm26_vm1, %v25_v2, 0.0  ;;  %v31_v6 = vmul.f32 %v25_v2, %v25_v2 }
  0x15   :  { %v29_v7 = vadd.f32 %v28_v4, %v27_v3  ;;  %v32_v8 = vsel %vm26_vm1, %v30_v5, 0.0 }
  0x16   :  { %v33_v9 = vsel %vm26_vm1, %v31_v6, 0.0 }
  0x17   :  { %v35_v10 = vsel %vm26_vm1, %v29_v7, 0.0  ;;  %v34_v11 = vadd.f32 %v33_v9, %v32_v8 }
  0x18   :  { %36 = vadd.xlane.f32.xlu0 %v35_v10 }
  0x19   :  { %v38_v12 = vsel %vm26_vm1, %v34_v11, 0.0 }
  0x1a   :  { %v56_v13 = vld [vmem:[#allocation2] sm:$0xff]  ;;  %v63_v18 = vld [vmem:[#allocation3] sm:$0xff] }
  0x1c   :  { %39 = vadd.xlane.f32.xlu0 %v38_v12 }
  0xa5   :  { %v37_v14 = vpop.xlane.xlu0 %36 }
  0xa6   :  { %v41_v15 = vmul.f32 0.015625, %v37_v14 }
  0xa8   :  { %v42_v16 = vmul.f32 %v41_v15, %v37_v14  ;;  %v57_v17 = vsub.f32 %v41_v15, %v56_v13 }
  0xa9   :  { %v40_v19 = vpop.xlane.xlu0 %39 }
  0xaa   :  { %v60_v20 = vadd.f32 %v57_v17, %v56_v13  ;;  %v65_v21 = vmul.f32 %v57_v17, %v57_v17  ;;  %v43_v22 = vsub.f32 %v40_v19, %v42_v16 }
  0xac   :  { %62 = vst.msk [vmem:[#allocation2] sm:$0xff] %vm48_vm0, %v60_v20  ;;  %v69_v23 = vmul.f32 0.0, %v65_v21  ;;  %v64_v24 = vadd.f32 %v63_v18, %v43_v22 }
  0xae   :  { %v70_v25 = vadd.f32 %v69_v23, %v64_v24 }
  0xb0   :  { %71 = vst.msk [vmem:[#allocation3] sm:$0xff] %vm48_vm0, %v70_v25 }
  0xb3   :  { %v75_v26 = vld [vmem:[#allocation2] sm:$0xff] }
  0xb4   :  { %76 = vst.msk [vmem:[%s161_s1] sm:$0xff] %vm48_vm0, %v75_v26 }
  0xb7   :  { %v77_v27 = vld [vmem:[#allocation3] sm:$0xff] }
  0xb8   :  { %v78_v28 = vmul.f32 0.015873017, %v77_v27 }
  0xba   :  { %79 = vst.msk [vmem:[%s162_s2] sm:$0xff] %vm48_vm0, %v78_v28 }
  0xbb   :  { %88 = vsyncpa [#allocation5], 1 }

</bundles_post_ra>
